<compile_context>
chip_gen: v6e
topology: v6e:2x2x1
jax: 0.10.0
libtpu: 0.0.40
codegen_flags: <defaults>
</compile_context>

<pallas_src>
import functools

import jax
import jax.numpy as jnp
from jax.experimental import pallas as pl
from jax.experimental.pallas import tpu as pltpu

MAX_TILE_N = 1024                 # rows per grid step, upper bound (sweep 512-2048)
VMEM_BUDGET_BYTES = 16 * 1024 * 1024   # stay under every generation's scoped default


def _round_up(x, m):
    return (x + m - 1) // m * m


def _num_tensorcores():
    """Best-effort TensorCores-per-chip (v7x / v4 / v5p: 2; v5e / v6e / v2 / v3: 1)."""
    try:
        kind = jax.devices()[0].device_kind.lower()
    except Exception:
        return 1
    if any(t in kind for t in ("v5 lite", "v5e", "v5litepod", "v6 lite", "v6e",
                               "v2", "v3")):
        return 1
    if any(t in kind for t in ("v4", "v5p", "v5 pod", "v7", "7x")):
        return 2
    return 1


def _vmem_estimate(tile_n, d_model, k_total, table_itemsize):
    resident = (k_total * d_model * table_itemsize   # stacked table (1 buffer)
                + 2 * d_model * 4                    # [vt; bias]
                + k_total * 4)                       # column iota
    per_step = 2 * tile_n * 3 * 4 + 2 * tile_n * d_model * 4    # rows + out (x2 bufs)
    live = tile_n * k_total * table_itemsize + 2 * tile_n * d_model * 4  # sel + acc
    return resident + per_step + live


def _pick_tile_n(n_rows, d_model, k_total, table_itemsize):
    num_cores = _num_tensorcores()
    n8 = _round_up(max(n_rows, 8), 8)
    if num_cores <= 1:
        # v5e/v6e: single TC -> fewest grid steps (possibly 1); extra steps are
        # pure ~0.35us/step overhead with zero parallelism gain.
        tile = min(MAX_TILE_N, n8)
    else:
        # v7x (2 TCs): target >= 2 steps per core so per-core DMAs pipeline.
        tile = MAX_TILE_N
        min_steps = 2 * num_cores
        while tile > 8 and pl.cdiv(n_rows, tile) < min_steps:
            tile //= 2
    # Clamp so the working set stays well under the scoped-VMEM default on all
    # generations (covers v7x's smaller VMEM if K_total*d grows beyond toy size).
    while tile > 8 and _vmem_estimate(tile, d_model, k_total,
                                      table_itemsize) > VMEM_BUDGET_BYTES:
        tile = _round_up(tile // 2, 8)
    return tile


def _jssp_kernel(rows_ref, col_ref, table_ref, vecs_ref, out_ref, *, num_emb):
    # rows_ref: (T, 3) f32 -> columns [time, machine_idx, num_emb + (j*O + o)]
    t = rows_ref[:, 0:1]                          # (T, 1) f32 time
    m = rows_ref[:, 1:2].astype(jnp.int32)        # (T, 1) machine idx (.long() trunc)
    p = rows_ref[:, 2:3].astype(jnp.int32)        # (T, 1) pre-shifted static-row idx

    col = col_ref[...]                            # (1, K) resident int32 column ids

    if pl.debug_checks_enabled():
        # In-kernel stand-in for the PyTorch host-side range asserts.
        k_total = table_ref.shape[0]
        pl.debug_check(jnp.all((m >= 0) & (m < num_emb)),
                       "machine_indices out of range")
        pl.debug_check(jnp.all((p >= num_emb) & (p < k_total)),
                       "pos indices out of range")

    # Two-hot selector over disjoint column ranges: one MXU matmul returns
    # P_mach[m] + static_tab[pos] directly.  Built in the table dtype (bf16 by
    # default) so the MXU runs at native rate and the (T, K) intermediate is
    # half-width; the 0/1 values are exact in bf16.
    sel = ((col == m) | (col == p)).astype(table_ref.dtype)
    gathered = jnp.dot(sel, table_ref[...], preferred_element_type=jnp.float32)

    # + t * (time_w @ Wt) + (proj_b + time_b @ Wt)  -- rank-1 time branch, f32 VPU.
    out = gathered + t * vecs_ref[0:1, :] + vecs_ref[1:2, :]
    # TODO(synk): when d_model < 128 this store lowers to masked vst.msk; for
    # production small-d configs present the output as a lane-dense
    # (n_total*d/128, 128) slab (requires an in-kernel cross-lane relayout) or
    # pick d_model % 128 == 0.  Skipped here: the kernel is VALU/overhead-bound
    # at these sizes and the relayout would add XLU/VMEM traffic.
    out_ref[...] = out.astype(out_ref.dtype)


def init_params(key, job_count, machine_count, d_model):
    num_emb = job_count * machine_count
    ks = jax.random.split(key, 7)
    # nn.Embedding default init ~ N(0, 1)
    job_tab = jax.random.normal(ks[0], (num_emb, d_model), jnp.float32)
    mach_tab = jax.random.normal(ks[1], (num_emb, d_model), jnp.float32)
    seq_tab = jax.random.normal(ks[2], (num_emb, d_model), jnp.float32)
    # nn.Linear(1, d_model): weight (d, 1), bias (d,)
    time_w = jax.random.uniform(ks[3], (d_model, 1), jnp.float32, -1.0, 1.0)
    time_b = jax.random.uniform(ks[4], (d_model,), jnp.float32, -1.0, 1.0)
    # nn.Linear(4d, d): weight (d, 4d), bias (d,)
    bound = 1.0 / (4 * d_model) ** 0.5
    proj_w = jax.random.uniform(ks[5], (d_model, 4 * d_model), jnp.float32,
                                -bound, bound)
    proj_b = jax.random.uniform(ks[6], (d_model,), jnp.float32, -bound, bound)
    return dict(job_tab=job_tab, mach_tab=mach_tab, seq_tab=seq_tab,
                time_w=time_w, time_b=time_b, proj_w=proj_w, proj_b=proj_b)


@functools.partial(jax.jit, static_argnames=("d_model", "gather_dtype"))
def jssp_embedding_forward(x, params, d_model, gather_dtype=jnp.bfloat16):
    B, J, O, _ = x.shape
    N = B * J * O
    JO = J * O
    num_emb = params["job_tab"].shape[0]
    k_total = num_emb + JO
    # Indices round-trip through f32 in the packed rows slab; exact below 2^24.
    assert k_total < (1 << 24), "index range too large for f32 row packing"

    # TODO(synk): the PyTorch host-side `assert *_indices.max() < num_embeddings`
    # has no host-assert equivalent under jit; out-of-range machine indices are
    # only caught by the pl.debug_check path (under pl.enable_debug_checks()).

    # ---- Fold the final projection into the tables (wrapper-side, one-time) ----
    wp = params["proj_w"].T                          # (4d, d)
    wj = wp[0 * d_model:1 * d_model]
    wm = wp[1 * d_model:2 * d_model]
    ws = wp[2 * d_model:3 * d_model]
    wt = wp[3 * d_model:4 * d_model]

    p_mach = params["mach_tab"] @ wm                 # (num_emb, d)
    p_job = params["job_tab"] @ wj                   # (num_emb, d)
    p_seq = params["seq_tab"] @ ws                   # (num_emb, d)

    pos = jnp.arange(JO, dtype=jnp.int32)            # pos = j*O + o
    static_tab = p_job[pos // O] + p_seq[pos % O]    # (JO, d), batch-independent
    # Stacked table, cast to the gather dtype (bf16 by default: native MXU rate,
    # half the resident VMEM/DMA bytes).  Pass gather_dtype=jnp.float32 for a
    # (near-)exact gather.
    table = jnp.concatenate([p_mach, static_tab], axis=0).astype(gather_dtype)

    vt = params["time_w"].T @ wt                               # (1, d)
    bias = params["proj_b"][None, :] + params["time_b"][None, :] @ wt  # (1, d)
    vecs = jnp.concatenate([vt, bias], axis=0)                 # (2, d) f32

    # Resident column-id row: avoids re-generating a (T, K) iota every grid step
    # (JAX does not hoist/CSE broadcast_in_dim across grid iterations).
    col_ids = jnp.arange(k_total, dtype=jnp.int32)[None, :]    # (1, K)

    # ---- Pack per-row inputs into a single slab: one small DMA per grid step ----
    times = x[..., 0].astype(jnp.float32).reshape(N, 1)
    machines = x[..., 1].astype(jnp.float32).reshape(N, 1)     # int-cast in kernel
    pos_shift = (pos + num_emb).astype(jnp.float32)            # "+num_emb" pre-folded
    pos_rows = jnp.broadcast_to(pos_shift[None, :], (B, JO)).reshape(N, 1)
    rows = jnp.concatenate([times, machines, pos_rows], axis=1)  # (N, 3)

    tile_n = _pick_tile_n(N, d_model, k_total, jnp.dtype(gather_dtype).itemsize)
    n_pad = (-N) % tile_n
    if n_pad:
        pad_row = jnp.array([[0.0, 0.0, float(num_emb)]], jnp.float32)
        rows = jnp.concatenate(
            [rows, jnp.broadcast_to(pad_row, (n_pad, 3))], axis=0)
    n_total = N + n_pad

    # TODO(synk): if num_emb + J*O grows very large, add a second "arbitrary"
    # grid axis over K with an f32 VMEM accumulator (pl.when init/finalize);
    # the VMEM budget clamp above only shrinks tile_n.
    out = pl.pallas_call(
        functools.partial(_jssp_kernel, num_emb=num_emb),
        out_shape=jax.ShapeDtypeStruct((n_total, d_model), jnp.float32),
        grid_spec=pltpu.PrefetchScalarGridSpec(
            num_scalar_prefetch=0,
            grid=(n_total // tile_n,),
            in_specs=[
                # Packed per-row inputs: double-buffered (default), one DMA/step.
                pl.BlockSpec((tile_n, 3), lambda i: (i, 0)),
                # Resident operands: constant index_map -> single-buffer them
                # (default double buffering would be pure VMEM waste).
                pl.BlockSpec((1, k_total), lambda i: (0, 0),
                             pipeline_mode=pl.Buffered(1)),
                pl.BlockSpec((k_total, d_model), lambda i: (0, 0),
                             pipeline_mode=pl.Buffered(1)),
                pl.BlockSpec((2, d_model), lambda i: (0, 0),
                             pipeline_mode=pl.Buffered(1)),
            ],
            out_specs=pl.BlockSpec((tile_n, d_model), lambda i: (i, 0)),
        ),
        compiler_params=pltpu.CompilerParams(
            dimension_semantics=("parallel",)),
    )(rows, col_ids, table, vecs)

    return out[:N].reshape(B, JO, d_model)


def _reference_forward(x, params, d_model):
    # Pure-JAX transcription of the PyTorch forward (correctness check).
    B, J, O, _ = x.shape
    N = B * J * O
    times = x[..., 0].astype(jnp.float32).reshape(N, 1)
    machines = x[..., 1].astype(jnp.int32).reshape(N)
    job_idx = jnp.broadcast_to(jnp.arange(J)[None, :, None], (B, J, O)).reshape(N)
    seq_idx = jnp.broadcast_to(jnp.arange(O)[None, None, :], (B, J, O)).reshape(N)
    job_emb = params["job_tab"][job_idx]
    mach_emb = params["mach_tab"][machines]
    seq_emb = params["seq_tab"][seq_idx]
    time_emb = times @ params["time_w"].T + params["time_b"]
    concat = jnp.concatenate([job_emb, mach_emb, seq_emb, time_emb], axis=-1)
    final = concat @ params["proj_w"].T + params["proj_b"]
    return final.reshape(B, J * O, d_model)


if __name__ == "__main__":
    job_count, machine_count, d_model = 4, 8, 32
    batch, num_jobs, num_operations = 2, job_count, 8

    key = jax.random.PRNGKey(0)
    k_param, k_time, k_mach = jax.random.split(key, 3)
    params = init_params(k_param, job_count, machine_count, d_model)

    times = jax.random.uniform(k_time, (batch, num_jobs, num_operations),
                               jnp.float32, 0.0, 10.0)
    machines = jax.random.randint(k_mach, (batch, num_jobs, num_operations),
                                  0, machine_count).astype(jnp.float32)
    x = jnp.stack([times, machines], axis=-1)   # (B, J, O, 2)

    ref = _reference_forward(x, params, d_model)

    # Default path: bf16 gather (table rounding ~1e-3 rel -> loose tolerance).
    out = jssp_embedding_forward(x, params, d_model)
    out = jax.block_until_ready(out)
    assert out.shape == (batch, num_jobs * num_operations, d_model)
    assert jnp.allclose(out, ref, atol=2e-2, rtol=2e-2)

    # Opt-in exact-gather path: f32 table (only the projection-fold reassociation
    # remains, so the tolerance is tight).
    out_f32 = jssp_embedding_forward(x, params, d_model, gather_dtype=jnp.float32)
    out_f32 = jax.block_until_ready(out_f32)
    assert jnp.allclose(out_f32, ref, atol=5e-4, rtol=5e-4)

    print("KERNEL_OK")
</pallas_src>

<mosaic_0001>
module attributes {stable_mosaic.version = 11 : i64} {
  func.func @_jssp_kernel(%arg0: i32, %arg1: memref<64x3xf32, #tpu.memory_space<vmem>>, %arg2: memref<1x64xi32, #tpu.memory_space<vmem>>, %arg3: memref<64x32xbf16, #tpu.memory_space<vmem>>, %arg4: memref<2x32xf32, #tpu.memory_space<vmem>>, %arg5: memref<64x32xf32, #tpu.memory_space<vmem>>) attributes {dimension_semantics = [#tpu.dimension_semantics<parallel>], iteration_bounds = array<i64: 1>, scalar_prefetch = 0 : i64, scratch_operands = 0 : i64, tpu.core_type = #tpu.core_type<tc>, window_params = [{transform_indices = @transform_0, window_bounds = array<i64: 64, 3>}, {pipeline_mode = #tpu.pipeline_mode<synchronous>, transform_indices = @transform_1, window_bounds = array<i64: 1, 64>}, {pipeline_mode = #tpu.pipeline_mode<synchronous>, transform_indices = @transform_2, window_bounds = array<i64: 64, 32>}, {pipeline_mode = #tpu.pipeline_mode<synchronous>, transform_indices = @transform_3, window_bounds = array<i64: 2, 32>}, {transform_indices = @transform_4, window_bounds = array<i64: 64, 32>}]} {
    %c0 = arith.constant 0 : index
    %c0_0 = arith.constant 0 : index
    %0 = vector.load %arg1[%c0, %c0_0] : memref<64x3xf32, #tpu.memory_space<vmem>>, vector<64x1xf32>
    %c0_1 = arith.constant 0 : index
    %c1 = arith.constant 1 : index
    %1 = vector.load %arg1[%c0_1, %c1] : memref<64x3xf32, #tpu.memory_space<vmem>>, vector<64x1xf32>
    %2 = arith.fptosi %1 : vector<64x1xf32> to vector<64x1xi32>
    %c0_2 = arith.constant 0 : index
    %c2 = arith.constant 2 : index
    %3 = vector.load %arg1[%c0_2, %c2] : memref<64x3xf32, #tpu.memory_space<vmem>>, vector<64x1xf32>
    %4 = arith.fptosi %3 : vector<64x1xf32> to vector<64x1xi32>
    %c0_3 = arith.constant 0 : index
    %c0_4 = arith.constant 0 : index
    %5 = vector.load %arg2[%c0_3, %c0_4] : memref<1x64xi32, #tpu.memory_space<vmem>>, vector<1x64xi32>
    %6 = vector.broadcast %5 : vector<1x64xi32> to vector<64x64xi32>
    %7 = vector.broadcast %2 : vector<64x1xi32> to vector<64x64xi32>
    %8 = arith.cmpi eq, %6, %7 : vector<64x64xi32>
    %9 = vector.broadcast %5 : vector<1x64xi32> to vector<64x64xi32>
    %10 = vector.broadcast %4 : vector<64x1xi32> to vector<64x64xi32>
    %11 = arith.cmpi eq, %9, %10 : vector<64x64xi32>
    %12 = arith.ori %8, %11 : vector<64x64xi1>
    %13 = arith.extui %12 : vector<64x64xi1> to vector<64x64xi32>
    %14 = arith.sitofp %13 : vector<64x64xi32> to vector<64x64xf32>
    %15 = arith.truncf %14 : vector<64x64xf32> to vector<64x64xbf16>
    %c0_5 = arith.constant 0 : index
    %c0_6 = arith.constant 0 : index
    %16 = vector.load %arg3[%c0_5, %c0_6] : memref<64x32xbf16, #tpu.memory_space<vmem>>, vector<64x32xbf16>
    %cst = arith.constant dense<0.000000e+00> : vector<64x32xf32>
    %17 = tpu.matmul %15, %16, %cst {dimension_numbers = #tpu.dot_dimension_numbers<[1], [0], [0], [1], [0, 0, 1, 1], [], []>} : vector<64x64xbf16>, vector<64x32xbf16>, vector<64x32xf32> -> vector<64x32xf32>
    %c0_7 = arith.constant 0 : index
    %c0_8 = arith.constant 0 : index
    %18 = vector.load %arg4[%c0_7, %c0_8] : memref<2x32xf32, #tpu.memory_space<vmem>>, vector<1x32xf32>
    %19 = vector.broadcast %0 : vector<64x1xf32> to vector<64x32xf32>
    %20 = vector.broadcast %18 : vector<1x32xf32> to vector<64x32xf32>
    %21 = arith.mulf %19, %20 : vector<64x32xf32>
    %22 = arith.addf %17, %21 : vector<64x32xf32>
    %c1_9 = arith.constant 1 : index
    %c0_10 = arith.constant 0 : index
    %23 = vector.load %arg4[%c1_9, %c0_10] : memref<2x32xf32, #tpu.memory_space<vmem>>, vector<1x32xf32>
    %24 = vector.broadcast %23 : vector<1x32xf32> to vector<64x32xf32>
    %25 = arith.addf %22, %24 : vector<64x32xf32>
    %c0_11 = arith.constant 0 : index
    %c0_12 = arith.constant 0 : index
    %26 = vector.load %arg5[%c0_11, %c0_12] : memref<64x32xf32, #tpu.memory_space<vmem>>, vector<64x32xf32>
    tpu.vector_store %arg5[%c0_11, %c0_12], %25 {strides = array<i32>} : memref<64x32xf32, #tpu.memory_space<vmem>>, vector<64x32xf32>,
    return
  }
  func.func @transform_0(%arg0: i32) -> (i32, i32) {
    %c0_i32 = arith.constant 0 : i32
    %c0_i32_0 = arith.constant 0 : i32
    return %arg0, %c0_i32 : i32, i32
  }
  func.func @transform_1(%arg0: i32) -> (i32, i32) {
    %c0_i32 = arith.constant 0 : i32
    %c0_i32_0 = arith.constant 0 : i32
    %c0_i32_1 = arith.constant 0 : i32
    return %c0_i32, %c0_i32_0 : i32, i32
  }
  func.func @transform_2(%arg0: i32) -> (i32, i32) {
    %c0_i32 = arith.constant 0 : i32
    %c0_i32_0 = arith.constant 0 : i32
    %c0_i32_1 = arith.constant 0 : i32
    return %c0_i32, %c0_i32_0 : i32, i32
  }
  func.func @transform_3(%arg0: i32) -> (i32, i32) {
    %c0_i32 = arith.constant 0 : i32
    %c0_i32_0 = arith.constant 0 : i32
    %c0_i32_1 = arith.constant 0 : i32
    return %c0_i32, %c0_i32_0 : i32, i32
  }
  func.func @transform_4(%arg0: i32) -> (i32, i32) {
    %c0_i32 = arith.constant 0 : i32
    %c0_i32_0 = arith.constant 0 : i32
    return %arg0, %c0_i32 : i32, i32
  }
}

</mosaic_0001>

<bundles_post_ra>
// kernel: squeeze.2
= control target key start
LH: loop header
LB: loop body
LE: loop exit
PB: predicated region body
PF: predicated region fallthrough
CT: control target
= control target key end

     0   :  { %vm12_vm0 = vcmask 64512   ;;  %s73_s10 = smov 40   ;;  %s74_s11 = smov 48   ;;  %vm18_vm1 = vcmask 523712   ;;  %vm24_vm2 = vcmask 458112   ;;  %vm30_vm3 = vcmask 392512   ;;  %s98_s0 = inlined_call_operand.vmem [shape: f32[2,4,8], index: 0, kind: input, shape index: {}]   ;;  %s99_s1 = inlined_call_operand.vmem [shape: f32[64,1], index: 1, kind: output, shape index: {}]  }
   0x1   :  { %v64_v0 = vld [vmem:[%s98_s0 + $0x4] sm:$0xf]  ;;  %v9_v1 = vld [vmem:[%s98_s0] sm:$0xf]  ;;  %s72_s0 = smov 56   ;;  %s75_s12 = smov 32  }
   0x2   :  { %8 = vst [vmem:[#allocation1 + $0x8] sm:$0xf] %v64_v0  ;;  %10 = vst [vmem:[#allocation1] sm:$0xf] %v9_v1  ;;  %s76_s13 = smov 24   ;;  %s77_s14 = smov 16  }
   0x3   :  { %s78_s15 = smov 8   ;;  %vm36_vm4 = vcmask 326912   ;;  %vm42_vm5 = vcmask 261312   ;;  %vm48_vm6 = vcmask 195712   ;;  %vm54_vm7 = vcmask 130112  }
   0x9   :  { %v15_v2 = vld [vmem:[#allocation1 + $0xb] sm:$0x1]   ;;  %v27_v3 = vld [vmem:[#allocation1 + $0x9] sm:$0x1]   ;;  %v21_v4 = vld [vmem:[#allocation1 + $0xa] sm:$0x1]  }
   0xa   :  { %16 = vrot.lane.b32.xlu0 %v15_v2, %s72_s0  ;;  %28 = vrot.lane.b32.xlu1 %v27_v3, %s73_s10  ;;  %v33_v5 = vld [vmem:[#allocation1 + $0x8] sm:$0x1]   ;;  %v11_v6 = vld [vmem:[#allocation1] sm:$0x1]   ;;  %v39_v7 = vld [vmem:[#allocation1 + $0x3] sm:$0x1]  }
   0xb   :  { %13 = vst.msk [vmem:[#allocation0] sm:$0x1] %vm12_vm0, %v11_v6   ;;  %v45_v8 = vld [vmem:[#allocation1 + $0x2] sm:$0x1]   ;;  %v51_v9 = vld [vmem:[#allocation1 + $0x1] sm:$0x1]  }
   0xe   :  { %22 = vrot.lane.b32.xlu0 %v21_v4, %s74_s11  ;;  %34 = vrot.lane.b32.xlu1 %v33_v5, %s75_s12 }
  0x12   :  { %40 = vrot.lane.b32.xlu0 %v39_v7, %s76_s13  ;;  %46 = vrot.lane.b32.xlu1 %v45_v8, %s77_s14 }
  0x16   :  { %52 = vrot.lane.b32.xlu0 %v51_v9, %s78_s15 }
  0x7c   :  { %v17_v10 = vpop.permute.xlu0 %16   ;;  %v29_v11 = vpop.permute.xlu1 %28  }
  0x7d   :  { %19 = vst.msk [vmem:[#allocation0] sm:$0x1] %vm18_vm1, %v17_v10  }
  0x80   :  { %v23_v12 = vpop.permute.xlu0 %22   ;;  %v35_v13 = vpop.permute.xlu1 %34  }
  0x81   :  { %25 = vst.msk [vmem:[#allocation0] sm:$0x1] %vm24_vm2, %v23_v12  }
  0x82   :  { %31 = vst.msk [vmem:[#allocation0] sm:$0x1] %vm30_vm3, %v29_v11  }
  0x83   :  { %37 = vst.msk [vmem:[#allocation0] sm:$0x1] %vm36_vm4, %v35_v13  }
  0x84   :  { %v41_v14 = vpop.permute.xlu0 %40   ;;  %v47_v15 = vpop.permute.xlu1 %46  }
  0x85   :  { %43 = vst.msk [vmem:[#allocation0] sm:$0x1] %vm42_vm5, %v41_v14  }
  0x86   :  { %49 = vst.msk [vmem:[#allocation0] sm:$0x1] %vm48_vm6, %v47_v15  }
  0x88   :  { %v53_v16 = vpop.permute.xlu0 %52  }
  0x89   :  { %55 = vst.msk [vmem:[#allocation0] sm:$0x1] %vm54_vm7, %v53_v16  }
  0x90   :  { %v60_v17 = vld [vmem:[#allocation0] sm:$0x1] }
  0x91   :  { %63 = vst [vmem:[%s99_s1] sm:$0x1] %v60_v17 }

// kernel: jssp_embedding_forward.1
= control target key start
LH: loop header
LB: loop body
LE: loop exit
PB: predicated region body
PF: predicated region fallthrough
CT: control target
= control target key end

     0   :  { %v441_v3 = vmov 1   ;;  %s549_s0 = inlined_call_operand.vmem [shape: f32[64,3], index: 0, kind: input, shape index: {}]   ;;  %s550_s1 = inlined_call_operand.vmem [shape: s32[1,64], index: 1, kind: input, shape index: {}]   ;;  %s551_s2 = inlined_call_operand.vmem [shape: bf16[64,32], index: 2, kind: input, shape index: {}]   ;;  %s552_s3 = inlined_call_operand.vmem [shape: f32[2,32], index: 3, kind: input, shape index: {}]   ;;  %s553_s4 = inlined_call_operand.hbm [shape: f32[64,32], index: 4, kind: output, shape index: {}]  }
   0x1   :  { %v476_v0 = vld [vmem:[%s549_s0 + $0x20] sm:$0xff]  ;;  %v486_v2 = vld [vmem:[%s549_s0 + $0x28] sm:$0xff]  ;;  %408 = vset.pattern.permute.xlu1 %v441_v3  ;;  %407 = vset.pattern.permute.xlu0 %v441_v3  ;;  %v497_v9 = vld [vmem:[%s549_s0 + $0x18] sm:$0xff] }
   0x2   :  { %v481_v1 = vld [vmem:[%s549_s0] sm:$0xff]  ;;  %v392_v4 = vtrunc.f32 %v476_v0  ;;  %v394_v6 = vtrunc.f32 %v486_v2  ;;  %v20_v7 = vld [vmem:[%s549_s0 + $0x8] sm:$0xff]  ;;  %v390_v14 = vtrunc.f32 %v497_v9 }
   0x3   :  { %v384_v5 = vtrunc.f32 %v481_v1  ;;  %v386_v8 = vtrunc.f32 %v20_v7 }
   0x4   :  { %v393_v10 = vcvt.f32.s32 %v392_v4  ;;  %v395_v12 = vcvt.f32.s32 %v394_v6 }
   0x5   :  { %v385_v11 = vcvt.f32.s32 %v384_v5  ;;  %v387_v13 = vcvt.f32.s32 %v386_v8 }
   0x6   :  { %53 = vperm.xlu1 %408, %v393_v10  }
   0x7   :  { %41 = vperm.xlu0 %407, %v385_v11  }
   0x8   :  { %9 = vsyncpa [#allocation3], 0  ;;  %v391_v15 = vcvt.f32.s32 %v390_v14  ;;  %v21_v16 = vld [vmem:[%s549_s0 + $0x10] sm:$0xff]  ;;  %v442_v17 = vmov 2   ;;  %v26_v22 = vld [vmem:[%s549_s0 + $0x38] sm:$0xff]  ;;  %v443_v30 = vmov 0  }
   0x9   :  { %v388_v18 = vtrunc.f32 %v21_v16  ;;  %v25_v19 = vld [vmem:[%s549_s0 + $0x30] sm:$0xff]  ;;  %v415_v23 = vld [vmem:[%s551_s2 + $0x18] sm:$0xff]   ;;  %v398_v24 = vtrunc.f32 %v26_v22  ;;  %v417_v28 = vld [vmem:[%s551_s2 + $0x8] sm:$0xff]   ;;  %v444_v41 = vmov 0.0   ;;  %vm217_vm9 = vcmask 523264  }
   0xa   :  { %56 = vperm.xlu1 %408, %v395_v12   ;;  %v396_v21 = vtrunc.f32 %v25_v19  ;;  %360 = vmatprep.subr.bf16.mxu0 %v415_v23  ;;  %v416_v26 = vld [vmem:[%s551_s2 + $0x10] sm:$0xff]   ;;  %v418_v29 = vld [vmem:[%s551_s2] sm:$0xff]  }
   0xb   :  { %44 = vperm.xlu0 %407, %v387_v13   ;;  %v389_v20 = vcvt.f32.s32 %v388_v18  ;;  %361 = vmatpush3.bf16.msra.mxu0 %v415_v23  ;;  %v399_v27 = vcvt.f32.s32 %v398_v24  ;;  %v333_v37 = vld [vmem:[%s550_s1] ss:$0 sm:$0xff]  ;;  %v351_v6 = vld [vmem:[%s552_s3 + $0x1] ss:$0 sm:$0xff] }
   0xc   :  { %v397_v25 = vcvt.f32.s32 %v396_v21  ;;  %376 = vmatprep.subr.bf16.mxu1 %v415_v23  ;;  %362 = vmatprep.subr.bf16.mxu0 %v416_v26 }
   0xd   :  { %380 = vmatpush3.bf16.msra.mxu1 %v415_v23 }
   0xe   :  { %409 = vset.pattern.permute.xlu1 %v442_v17  ;;  %377 = vmatprep.subr.bf16.mxu1 %v416_v26 }
   0xf   :  { %50 = vperm.xlu0 %407, %v391_v15   ;;  %76 = vperm.xlu1 %409, %v387_v13  }
  0x10   :  { %363 = vmatpush3.bf16.msra.mxu0 %v416_v26 }
  0x11   :  { %381 = vmatpush3.bf16.msra.mxu1 %v416_v26  ;;  %364 = vmatprep.subr.bf16.mxu0 %v417_v28 }
  0x12   :  { %378 = vmatprep.subr.bf16.mxu1 %v417_v28 }
  0x13   :  { %411 = vset.pattern.permute.xlu0 %v442_v17  ;;  %85 = vperm.xlu1 %409, %v393_v10  }
  0x14   :  { %73 = vperm.xlu0 %411, %v385_v11   ;;  %365 = vmatpush3.bf16.msra.mxu0 %v417_v28 }
  0x15   :  { %382 = vmatpush3.bf16.msra.mxu1 %v417_v28  ;;  %366 = vmatprep.subr.bf16.mxu0 %v418_v29 }
  0x16   :  { %379 = vmatprep.subr.bf16.mxu1 %v418_v29 }
  0x17   :  { %410 = vset.pattern.permute.xlu1 %v441_v3 }
  0x18   :  { %88 = vperm.xlu0 %411, %v395_v12   ;;  %47 = vperm.xlu1 %410, %v389_v20  }
  0x19   :  { %367 = vmatpush3.bf16.msra.mxu0 %v418_v29  ;;  %383 = vmatpush3.bf16.msra.mxu1 %v418_v29 }
  0x1c   :  { %79 = vperm.xlu0 %411, %v389_v20   ;;  %59 = vperm.xlu1 %410, %v397_v25  }
  0x20   :  { %94 = vperm.xlu0 %411, %v399_v27   ;;  %62 = vperm.xlu1 %410, %v399_v27  }
  0x24   :  { %412 = vset.pattern.permute.xlu1 %v442_v17  ;;  %414 = vset.pattern.permute.xlu0 %v443_v30 }
  0x25   :  { %82 = vperm.xlu1 %412, %v391_v15   ;;  %148 = vperm.xlu0 %414, %v20_v7  }
  0x29   :  { %91 = vperm.xlu1 %412, %v397_v25   ;;  %163 = vperm.xlu0 %414, %v476_v0  }
  0x2d   :  { %413 = vset.pattern.permute.xlu1 %v443_v30  ;;  %173 = vperm.xlu0 %414, %v25_v19  }
  0x2e   :  { %143 = vperm.xlu1 %413, %v481_v1  }
  0x32   :  { %153 = vperm.xlu1 %413, %v21_v16  }
  0x36   :  { %158 = vperm.xlu1 %413, %v497_v9  }
  0x3a   :  { %168 = vperm.xlu1 %413, %v486_v2   ;;  %v342_v2 = vld [vmem:[%s552_s3] ss:$0 sm:$0xff]  ;;  %s445_s3 = smov [#allocation2]  }
  0x3b   :  { %s322_s16 = sshll.u32 %s445_s3, 4  ;;  %s323_s16 = int_to_ptr.vmem [resolvable:$true] %s322_s16 }
  0x3c   :  { %s419_s17 = scalar_lea.vmem %s323_s16, 1024  ;;  %p424_p1 = scmp.lt.s32.totalorder %s323_s16, %s323_s16 }
  0x3d   :  { %p420_p0 = scmp.ne.s32.totalorder %s323_s16, %s419_s17  ;;  %p425_p2 = scmp.lt.s32.totalorder %s419_s17, %s419_s17 }
  0x3e   :  { %178 = vperm.xlu1 %413, %v26_v22  }
  0x3f   :  { %p426_p3 = por %p425_p2, %p424_p1 }
  0x41   :  { %p427_p4 = pnand %p426_p3, %p420_p0 }
  0x81   :  { %v54_v31 = vpop.permute.xlu1 %53 }
  0x82   :  { %v42_v32 = vpop.permute.xlu0 %41  ;;  %vm68_vm6 = vcmp.eq.s32.totalorder %v333_v37, %v54_v31 }
  0x83   :  { %vm64_vm5 = vcmp.eq.s32.totalorder %v333_v37, %v42_v32 }
  0x85   :  { %v57_v33 = vpop.permute.xlu1 %56 }
  0x86   :  { %v45_v34 = vpop.permute.xlu0 %44  ;;  %vm69_vm10 = vcmp.eq.s32.totalorder %v333_v37, %v57_v33 }
  0x87   :  { %vm65_vm0 = vcmp.eq.s32.totalorder %v333_v37, %v45_v34 }
  0x8a   :  { %v51_v35 = vpop.permute.xlu0 %50  ;;  %v77_v36 = vpop.permute.xlu1 %76 }
  0x8b   :  { %vm97_vm1 = vcmp.eq.s32.totalorder %v333_v37, %v77_v36 }
  0x8c   :  { %vm105_vm2 = vmor %vm65_vm0, %vm97_vm1  ;;  %vm67_vm0 = vcmp.eq.s32.totalorder %v333_v37, %v51_v35 }
  0x8d   :  { %v335_v43 = vsel %vm105_vm2, 1.0, %v444_v41 }
  0x8e   :  { %v86_v38 = vpop.permute.xlu1 %85 }
  0x8f   :  { %v74_v39 = vpop.permute.xlu0 %73  ;;  %vm100_vm3 = vcmp.eq.s32.totalorder %v333_v37, %v86_v38 }
  0x90   :  { %vm96_vm4 = vcmp.eq.s32.totalorder %v333_v37, %v74_v39  ;;  %vm108_vm8 = vmor %vm68_vm6, %vm100_vm3 }
  0x91   :  { %vm104_vm7 = vmor %vm64_vm5, %vm96_vm4  ;;  %v338_v46 = vsel %vm108_vm8, 1.0, %v444_v41 }
  0x92   :  { %v334_v42 = vsel %vm104_vm7, 1.0, %v444_v41 }
  0x93   :  { %v89_v40 = vpop.permute.xlu0 %88  ;;  %v48_v44 = vpop.permute.xlu1 %47  ;;  %v128_v45 = vpack.c.bf16 %v335_v43, %v334_v42 }
  0x94   :  { %vm101_vm11 = vcmp.eq.s32.totalorder %v333_v37, %v89_v40  ;;  %vm66_vm14 = vcmp.eq.s32.totalorder %v333_v37, %v48_v44 }
  0x95   :  { %vm109_vm12 = vmor %vm69_vm10, %vm101_vm11  ;;  %368 = vmatprep.mubr.msk.bf16.mxu0 %vm217_vm9, %v128_v45 }
  0x96   :  { %v339_v47 = vsel %vm109_vm12, 1.0, %v444_v41 }
  0x97   :  { %v130_v48 = vpack.c.bf16 %v339_v47, %v338_v46  ;;  %v60_v49 = vpop.permute.xlu1 %59  ;;  %v80_v50 = vpop.permute.xlu0 %79 }
  0x98   :  { %vm98_vm13 = vcmp.eq.s32.totalorder %v333_v37, %v80_v50  ;;  %vm70_vm6 = vcmp.eq.s32.totalorder %v333_v37, %v60_v49 }
  0x99   :  { %372 = vmatprep.mubr.msk.bf16.mxu1 %vm217_vm9, %v130_v48  ;;  %vm106_vm15 = vmor %vm66_vm14, %vm98_vm13 }
  0x9a   :  { %v336_v54 = vsel %vm106_vm15, 1.0, %v444_v41 }
  0x9b   :  { %v63_v51 = vpop.permute.xlu1 %62  ;;  %v95_v52 = vpop.permute.xlu0 %94 }
  0x9c   :  { %vm103_vm1 = vcmp.eq.s32.totalorder %v333_v37, %v95_v52  ;;  %vm71_vm2 = vcmp.eq.s32.totalorder %v333_v37, %v63_v51 }
  0x9d   :  { %vm111_vm5 = vmor %vm71_vm2, %vm103_vm1 }
  0x9e   :  { %v341_v58 = vsel %vm111_vm5, 1.0, %v444_v41 }
  0xa0   :  { %v83_v53 = vpop.permute.xlu1 %82  ;;  %v149_v63 = vpop.permute.xlu0 %148 }
  0xa1   :  { %vm99_vm3 = vcmp.eq.s32.totalorder %v333_v37, %v83_v53  ;;  %v186_v16 = vmul.f32 %v342_v2, %v149_v63 }
  0xa2   :  { %vm107_vm4 = vmor %vm67_vm0, %vm99_vm3 }
  0xa3   :  { %v337_v55 = vsel %vm107_vm4, 1.0, %v444_v41 }
  0xa4   :  { %v129_v56 = vpack.c.bf16 %v337_v55, %v336_v54  ;;  %v92_v57 = vpop.permute.xlu1 %91  ;;  %v164_v1 = vpop.permute.xlu0 %163 }
  0xa5   :  { %vm102_vm7 = vcmp.eq.s32.totalorder %v333_v37, %v92_v57  ;;  %v189_v19 = vmul.f32 %v342_v2, %v164_v1 }
  0xa6   :  { %vm110_vm8 = vmor %vm70_vm6, %vm102_vm7  ;;  %369 = vmatmul.mubr.msk.bf16.vlgmr.msra.gmra.mxu0 %vm217_vm9, %v129_v56 }
  0xa7   :  { %v340_v59 = vsel %vm110_vm8, 1.0, %v444_v41 }
  0xa8   :  { %v131_v60 = vpack.c.bf16 %v341_v58, %v340_v59  ;;  %v174_v7 = vpop.permute.xlu0 %173 }
  0xa9   :  { %v144_v61 = vpop.permute.xlu1 %143  ;;  %v191_v14 = vmul.f32 %v342_v2, %v174_v7 }
  0xaa   :  { %373 = vmatmul.mubr.msk.bf16.vlgmr.msra.gmra.mxu1 %vm217_vm9, %v131_v60  ;;  %v185_v8 = vmul.f32 %v342_v2, %v144_v61  ;;  %vm308_vm9 = vcmask 261120  }
  0xad   :  { %v154_v62 = vpop.permute.xlu1 %153 }
  0xae   :  { %v187_v4 = vmul.f32 %v342_v2, %v154_v62 }
  0xb1   :  { %v159_v0 = vpop.permute.xlu1 %158 }
  0xb2   :  { %v188_v11 = vmul.f32 %v342_v2, %v159_v0 }
  0xb5   :  { %v169_v3 = vpop.permute.xlu1 %168 }
  0xb6   :  { %v190_v31 = vmul.f32 %v342_v2, %v169_v3 }
  0xb9   :  { %v179_v12 = vpop.permute.xlu1 %178 }
  0xba   :  { %v192_v23 = vmul.f32 %v342_v2, %v179_v12 }
 0x166   :  { %v370_v5 = vpop.f32.mrf.mxu0 }
 0x167   :  { %v273_v9 = vadd.f32 %v370_v5, %v187_v4 }
 0x168   :  { %v264_v10 = vpop.f32.mrf.mxu0 }
 0x169   :  { %v302_v13 = vadd.f32 %v351_v6, %v273_v9  ;;  %v265_v15 = vadd.f32 %v264_v10, %v185_v8 }
 0x16a   :  { %v371_v17 = vpop.f32.mrf.mxu0  ;;  %v374_v18 = vpop.f32.mrf.mxu1 }
 0x16b   :  { %311 = vst.msk [vmem:[#allocation2 + $0x10] sm:$0xff] %vm308_vm9, %v302_v13  ;;  %v300_v20 = vadd.f32 %v351_v6, %v265_v15  ;;  %v276_v21 = vadd.f32 %v371_v17, %v188_v11  ;;  %v289_v22 = vadd.f32 %v374_v18, %v191_v14 }
 0x16c   :  { %v267_v24 = vpop.f32.mrf.mxu0  ;;  %v280_v25 = vpop.f32.mrf.mxu1 }
 0x16d   :  { %309 = vst.msk [vmem:[#allocation2] sm:$0xff] %vm308_vm9, %v300_v20  ;;  %v303_v26 = vadd.f32 %v351_v6, %v276_v21  ;;  %v306_v27 = vadd.f32 %v351_v6, %v289_v22  ;;  %v268_v28 = vadd.f32 %v267_v24, %v186_v16  ;;  %v281_v29 = vadd.f32 %v280_v25, %v189_v19 }
 0x16e   :  { %v375_v30 = vpop.f32.mrf.mxu1 }
 0x16f   :  { %312 = vst.msk [vmem:[#allocation2 + $0x18] sm:$0xff] %vm308_vm9, %v303_v26  ;;  %315 = vst.msk [vmem:[#allocation2 + $0x30] sm:$0xff] %vm308_vm9, %v306_v27  ;;  %v301_v32 = vadd.f32 %v351_v6, %v268_v28  ;;  %v304_v33 = vadd.f32 %v351_v6, %v281_v29  ;;  %v292_v34 = vadd.f32 %v375_v30, %v192_v23 }
 0x170   :  { %v283_v35 = vpop.f32.mrf.mxu1 }
 0x171   :  { %310 = vst.msk [vmem:[#allocation2 + $0x8] sm:$0xff] %vm308_vm9, %v301_v32  ;;  %313 = vst.msk [vmem:[#allocation2 + $0x20] sm:$0xff] %vm308_vm9, %v304_v33  ;;  %v307_v36 = vadd.f32 %v351_v6, %v292_v34  ;;  %v284_v37 = vadd.f32 %v283_v35, %v190_v31 }
 0x173   :  { %316 = vst.msk [vmem:[#allocation2 + $0x38] sm:$0xff] %vm308_vm9, %v307_v36  ;;  %v305_v38 = vadd.f32 %v351_v6, %v284_v37 }
 0x175   :  { %314 = vst.msk [vmem:[#allocation2 + $0x28] sm:$0xff] %vm308_vm9, %v305_v38 }
 0x176   :  { %430 = shalt.err (!%p427_p4)
}
 0x177   :  { %s446_s18 = smov 128   ;;  %s447_s19 = smov 8  }
 0x178   :  { %328 = dma.vmem_to_hbm [thread:$0]  %s323_s16, 1024, %s553_s4, [#allocation3], %s446_s18, %s446_s18, %s447_s19  }
 0x179   :  { %439 = dma.done.wait [#allocation3], 1024  }
 0x17a   :  { %440 = vsyncadd [#allocation3], 4294966272 }
 0x17b   :  { %332 = vsyncpa [#allocation3], 1 }

</bundles_post_ra>
